<compile_context>
chip_gen: v7x
topology: tpu7x:2x2x1
jax: 0.10.0
libtpu: 0.0.40
codegen_flags: <defaults>
</compile_context>

<pallas_src>
import jax
import jax.numpy as jnp
from jax.experimental import pallas as pl
from jax.experimental.pallas import tpu as pltpu

_LANE = 128
# 8192 rows x 128 lanes x 4 B = 4 MiB per f32 tile; double-buffered in+out
# = 16 MiB, within the 40 MiB scoped-VMEM limit requested below on every
# generation (v7x physical VMEM is 64 MiB per TC -> plenty of headroom).
_MAX_BLOCK_ROWS = 8192
# Below this, a single whole-slab block is used (tiny slabs don't benefit
# from pipelining and a full-array block is always a legal BlockSpec).
_MIN_BLOCK_ROWS = 512
# Below this element count the fixed pallas_call launch / DMA-setup cost
# dominates; plain jnp (fused by XLA) is strictly faster.
_SMALL_N = 256 * 1024
_VMEM_LIMIT_BYTES = 40 * 1024 * 1024


def _mpointwise_kernel(w_ref, x_ref, o_ref):
    # w_ref: SMEM scalar (shape (1,)); x_ref / o_ref: VMEM tiles.
    # 3 VPU muls per element — pure filler underneath the streaming DMAs.
    w = w_ref[0]
    x = x_ref[...]
    o_ref[...] = (w * w) * (x * x * x)


def _choose_block_rows(rows: int) -> int:
    """Pick a (8-aligned) row tile giving >=~4 pipelined grid steps."""
    if rows <= _MIN_BLOCK_ROWS:
        return rows  # whole slab in one block (full-array block is legal)
    target = pl.cdiv(rows, 4)           # aim for >= 4 grid steps
    target = ((target + 7) // 8) * 8     # keep the sublane dim 8-aligned
    return max(_MIN_BLOCK_ROWS, min(_MAX_BLOCK_ROWS, target))


def _run_kernel(x2d: jax.Array, w1: jax.Array) -> jax.Array:
    rows = x2d.shape[0]
    block_rows = _choose_block_rows(rows)
    grid = (pl.cdiv(rows, block_rows),)

    return pl.pallas_call(
        _mpointwise_kernel,
        out_shape=jax.ShapeDtypeStruct(x2d.shape, x2d.dtype),
        grid_spec=pltpu.PrefetchScalarGridSpec(
            num_scalar_prefetch=0,
            grid=grid,
            in_specs=[
                pl.BlockSpec(memory_space=pltpu.MemorySpace.SMEM),    # w scalar
                pl.BlockSpec((block_rows, _LANE), lambda i: (i, 0)),  # x tile
            ],
            out_specs=pl.BlockSpec((block_rows, _LANE), lambda i: (i, 0)),
        ),
        compiler_params=pltpu.CompilerParams(
            dimension_semantics=("parallel",),
            vmem_limit_bytes=_VMEM_LIMIT_BYTES,
        ),
    )(w1, x2d)


def mpointwise_g(x: jax.Array, w: jax.Array, *,
                 min_kernel_elems: int = _SMALL_N) -> jax.Array:
    """Computes w**2 * x**3 elementwise.

    x: any shape (NCHW in the reference module), float32
    w: scalar parameter (shape (1,) like nn.Parameter(torch.ones(1)))
    min_kernel_elems: inputs smaller than this use a plain-jnp fast path
      (launch overhead dominates there); set to 0 to force the Pallas kernel.
    """
    orig_shape = x.shape
    n = x.size
    w1 = jnp.reshape(w, (1,)).astype(x.dtype)

    # Small-input fast path: let XLA fuse it; the pallas_call fixed cost
    # dominates completely at these sizes.
    if n < min_kernel_elems:
        wv = w1[0]
        return (wv * wv) * (x * x * x)

    aligned_n = (n // _LANE) * _LANE

    if aligned_n == n:
        # Fast path: free metadata reshape, no extra HBM pass.
        rows = n // _LANE
        x2d = jnp.reshape(x, (rows, _LANE))
        out2d = _run_kernel(x2d, w1)
        return jnp.reshape(out2d, orig_shape)

    # Unaligned path: kernel on the 128-aligned prefix, tiny (<128 element)
    # tail with plain jnp.  Avoids the pad + slice HBM round trip of v1.
    x_flat = jnp.reshape(x, (-1,))
    rows = aligned_n // _LANE
    wv = w1[0]
    if rows > 0:
        head2d = jnp.reshape(x_flat[:aligned_n], (rows, _LANE))
        head_out = jnp.reshape(_run_kernel(head2d, w1), (-1,))
    else:
        head_out = x_flat[:0]
    tail = x_flat[aligned_n:]
    tail_out = (wv * wv) * (tail * tail * tail)
    out_flat = jnp.concatenate([head_out, tail_out])
    return jnp.reshape(out_flat, orig_shape)


if __name__ == "__main__":
    key = jax.random.PRNGKey(0)
    # NCHW input consistent with a conv-style module: batch=2, channels=4, 16x16
    x = jax.random.normal(key, (2, 4, 16, 16), dtype=jnp.float32)

    # Deterministic parameter init matching nn.Parameter(torch.ones(1))
    w = jnp.ones((1,), dtype=jnp.float32)

    # Force the Pallas path even at the small demo size so the kernel itself
    # is compiled and executed on the TPU.
    out_kernel = jax.block_until_ready(mpointwise_g(x, w, min_kernel_elems=0))
    # Default dispatch (small-input jnp fast path) must agree.
    out_default = jax.block_until_ready(mpointwise_g(x, w))

    ref = (w[0] ** 2) * (x ** 3)
    assert out_kernel.shape == x.shape
    assert jnp.allclose(out_kernel, ref, atol=1e-5, rtol=1e-5)
    assert jnp.allclose(out_default, ref, atol=1e-5, rtol=1e-5)

    print("KERNEL_OK")
</pallas_src>

<mosaic_0001>
module attributes {stable_mosaic.version = 11 : i64} {
  func.func @_mpointwise_kernel(%arg0: i32, %arg1: memref<1xf32, #tpu.memory_space<smem>>, %arg2: memref<16x128xf32, #tpu.memory_space<vmem>>, %arg3: memref<16x128xf32, #tpu.memory_space<vmem>>) attributes {dimension_semantics = [#tpu.dimension_semantics<parallel>], iteration_bounds = array<i64: 1>, scalar_prefetch = 0 : i64, scratch_operands = 0 : i64, tpu.core_type = #tpu.core_type<tc>, window_params = [{transform_indices = @transform_0, window_bounds = array<i64: 1>}, {transform_indices = @transform_1, window_bounds = array<i64: 16, 128>}, {transform_indices = @transform_2, window_bounds = array<i64: 16, 128>}]} {
    %c0 = arith.constant 0 : index
    %0 = memref.load %arg1[%c0] : memref<1xf32, #tpu.memory_space<smem>>
    %c0_0 = arith.constant 0 : index
    %c0_1 = arith.constant 0 : index
    %1 = vector.load %arg2[%c0_0, %c0_1] : memref<16x128xf32, #tpu.memory_space<vmem>>, vector<16x128xf32>
    %2 = arith.mulf %0, %0 : f32
    %3 = arith.mulf %1, %1 : vector<16x128xf32>
    %4 = arith.mulf %3, %1 : vector<16x128xf32>
    %5 = vector.broadcast %2 : f32 to vector<16x128xf32>
    %6 = arith.mulf %5, %4 : vector<16x128xf32>
    %c0_2 = arith.constant 0 : index
    %c0_3 = arith.constant 0 : index
    %7 = vector.load %arg3[%c0_2, %c0_3] : memref<16x128xf32, #tpu.memory_space<vmem>>, vector<16x128xf32>
    tpu.vector_store %arg3[%c0_2, %c0_3], %6 {strides = array<i32>} : memref<16x128xf32, #tpu.memory_space<vmem>>, vector<16x128xf32>,
    return
  }
  func.func @transform_0(%arg0: i32) -> i32 {
    %c0_i32 = arith.constant 0 : i32
    %c0_i32_0 = arith.constant 0 : i32
    return %c0_i32 : i32
  }
  func.func @transform_1(%arg0: i32) -> (i32, i32) {
    %c0_i32 = arith.constant 0 : i32
    %c0_i32_0 = arith.constant 0 : i32
    return %arg0, %c0_i32 : i32, i32
  }
  func.func @transform_2(%arg0: i32) -> (i32, i32) {
    %c0_i32 = arith.constant 0 : i32
    %c0_i32_0 = arith.constant 0 : i32
    return %arg0, %c0_i32 : i32, i32
  }
}

</mosaic_0001>

<bundles_post_ra>
// kernel: tpu_custom_call.1
= control target key start
LH: loop header
LB: loop body
LE: loop exit
PB: predicated region body
PF: predicated region fallthrough
CT: control target
= control target key end

     0   :  { %8 = vsyncpa [#allocation4], 0  ;;  %s162_s0 = inlined_call_operand.<no memory space> [shape: f32[1], index: 0, kind: input, shape index: {}]   ;;  %s163_s1 = inlined_call_operand.hbm [shape: f32[16,128], index: 1, kind: input, shape index: {}]   ;;  %s164_s2 = inlined_call_operand.hbm [shape: f32[16,128], index: 2, kind: output, shape index: {}]  }
   0x1   :  { %9 = vsyncpa [#allocation5], 0  ;;  %s109_s9 = smov [#allocation3]   ;;  %s61_s13 = scalar_lea.hbm %s163_s1, 256 }
   0x2   :  { %s17_s10 = sshll.u32 %s109_s9, 4  ;;  %p62_p0 = scmp.ne.s32.totalorder %s163_s1, %s61_s13  ;;  %s18_s10 = int_to_ptr.vmem [resolvable:$true] %s17_s10 }
   0x3   :  { %p65_p1 = scmp.lt.u32.totalorder %s61_s13, %s163_s1 }
   0x5   :  { %p67_p2 = pnand %p65_p1, %p62_p0 }
   0x7   :  { %70 = shalt.err (!%p67_p2)
}
   0x8   :  { %s71_s18 = scalar_lea.vmem %s18_s10, 256  ;;  %p76_p4 = scmp.lt.s32.totalorder %s18_s10, %s18_s10 }
   0x9   :  { %p72_p3 = scmp.ne.s32.totalorder %s18_s10, %s71_s18  ;;  %p77_p5 = scmp.lt.s32.totalorder %s71_s18, %s71_s18 }
   0xb   :  { %p78_p6 = por %p77_p5, %p76_p4 }
   0xd   :  { %p79_p7 = pnand %p78_p6, %p72_p3 }
   0xf   :  { %82 = shalt.err (!%p79_p7)
}
  0x10   :  { %s110_s19 = smov 128   ;;  %s111_s20 = smov 8  }
  0x11   :  { %23 = dma.hbm_to_vmem [thread:$0]  %s163_s1, 256, %s18_s10, [#allocation4], %s110_s19, %s110_s19, %s111_s20  }
  0x12   :  { %105 = dma.done.wait [#allocation4], 256  }
  0x13   :  { %106 = vsyncadd [#allocation4], 4294967040  ;;  %s30_s25 = smul.f32 %s162_s0, %s162_s0  ;;  %v28_v0 = vld [vmem:[#allocation3] sm:$0xff]  ;;  %v29_v1 = vld [vmem:[#allocation3 + $0x8] sm:$0xff]  ;;  %s112_s26 = smov [#allocation6]  }
  0x14   :  { %v31_v2 = vmul.f32 %v28_v0, %v28_v0  ;;  %v32_v3 = vmul.f32 %v29_v1, %v29_v1  ;;  %s45_s27 = sshll.u32 %s112_s26, 4  ;;  %s46_s27 = int_to_ptr.vmem [resolvable:$true] %s45_s27 }
  0x15   :  { %v35_v4 = vstv %s30_s25  ;;  %s83_s1 = scalar_lea.vmem %s46_s27, 256  ;;  %p88_p9 = scmp.lt.s32.totalorder %s46_s27, %s46_s27 }
  0x16   :  { %v33_v5 = vmul.f32 %v31_v2, %v28_v0  ;;  %v34_v6 = vmul.f32 %v32_v3, %v29_v1  ;;  %p84_p8 = scmp.ne.s32.totalorder %s46_s27, %s83_s1  ;;  %p89_p10 = scmp.lt.s32.totalorder %s83_s1, %s83_s1 }
  0x18   :  { %v36_v7 = vmul.f32 %v35_v4, %v33_v5  ;;  %v37_v8 = vmul.f32 %v35_v4, %v34_v6  ;;  %p90_p11 = por %p89_p10, %p88_p9 }
  0x1a   :  { %38 = vst [vmem:[#allocation6] sm:$0xff] %v36_v7  ;;  %39 = vst [vmem:[#allocation6 + $0x8] sm:$0xff] %v37_v8  ;;  %p91_p12 = pnand %p90_p11, %p84_p8 }
  0x1c   :  { %94 = shalt.err (!%p91_p12)
}
  0x1d   :  { %s95_s29 = scalar_lea.hbm %s164_s2, 256 }
  0x1e   :  { %p96_p13 = scmp.ne.s32.totalorder %s164_s2, %s95_s29  ;;  %p99_p0 = scmp.lt.u32.totalorder %s95_s29, %s164_s2 }
  0x20   :  { %p101_p1 = pnand %p99_p0, %p96_p13 }
  0x22   :  { %104 = shalt.err (!%p101_p1)
}
  0x23   :  { %51 = dma.vmem_to_hbm [thread:$0]  %s46_s27, 256, %s164_s2, [#allocation5], %s110_s19, %s110_s19, %s111_s20  }
  0x24   :  { %107 = dma.done.wait [#allocation5], 256  }
  0x25   :  { %108 = vsyncadd [#allocation5], 4294967040 }
  0x26   :  { %55 = vsyncpa [#allocation4], 1 }
  0x27   :  { %56 = vsyncpa [#allocation5], 1 }

</bundles_post_ra>
